<compile_context>
chip_gen: v6e
topology: v6e:2x2x1
jax: 0.10.0
libtpu: 0.0.40
codegen_flags: <defaults>
</compile_context>

<pallas_src>
import math

import numpy as np

import jax
import jax.numpy as jnp
from jax.experimental import pallas as pl
from jax.experimental.pallas import tpu as pltpu


# ----------------------------------------------------------------------------
# Fused sin/cos with a single shared Cody-Waite argument reduction (f32).
# Accurate (abs err ~3e-7) for |x| up to a few thousand radians, which covers
# diffusion timesteps (t <= ~1e3, freqs <= 1).
# ----------------------------------------------------------------------------
_TWO_OVER_PI = 0.6366197723675814
# pi/2 split so that kf * _PIO2_HI is exact for |kf| < 2^13 (Cephes DP1..3 * 2).
_PIO2_HI = 1.5703125
_PIO2_MD = 4.837512969970703125e-4
_PIO2_LO = 7.54978995489188216e-8
# Minimax polynomial coefficients on [-pi/4, pi/4] (Cephes sinf/cosf).
_S1, _S2, _S3 = -1.6666654611e-1, 8.3321608736e-3, -1.9515295891e-4
_C1, _C2, _C3 = 4.166664568298827e-2, -1.388731625493765e-3, 2.443315711809948e-5


def _sincos(x):
    """Return (sin(x), cos(x)) for f32 x, sharing one argument reduction."""
    kf = jnp.floor(x * _TWO_OVER_PI + 0.5)            # nearest multiple of pi/2
    k = kf.astype(jnp.int32)
    r = x - kf * _PIO2_HI                              # exact
    r = r - kf * _PIO2_MD
    r = r - kf * _PIO2_LO                              # |r| <~ pi/4
    r2 = r * r
    sin_r = r + r * r2 * (_S1 + r2 * (_S2 + r2 * _S3))
    cos_r = 1.0 - 0.5 * r2 + r2 * r2 * (_C1 + r2 * (_C2 + r2 * _C3))
    # Quadrant selection: q = k mod 4.
    swap = (k & 1) == 1
    sin_v = jnp.where(swap, cos_r, sin_r)
    cos_v = jnp.where(swap, sin_r, cos_r)
    sin_v = jnp.where((k & 2) != 0, -sin_v, sin_v)
    cos_v = jnp.where(((k + 1) & 2) != 0, -cos_v, cos_v)
    return sin_v, cos_v


def _timestep_emb_kernel(t_ref, freqs_ref, o_ref):
    """t_ref: [tile, 1] f32; freqs_ref: [1, half] f32; o_ref: [tile, 2*half]."""
    half = freqs_ref.shape[-1]
    arg = t_ref[...] * freqs_ref[...]                  # [tile, half] VPU broadcast
    s, c = _sincos(arg)
    o_ref[:, :half] = s.astype(o_ref.dtype)
    o_ref[:, half:] = c.astype(o_ref.dtype)


def _make_freqs(hidden_size: int) -> jax.Array:
    half = hidden_size // 2
    emb = math.log(10000.0) / (half - 1)
    return jnp.exp(jnp.arange(half, dtype=jnp.float32) * -emb).reshape(1, half)


def diffusion_timestep_embedding(timesteps: jax.Array, hidden_size: int,
                                 *, tile_b: int = 1024,
                                 out_dtype=jnp.float32) -> jax.Array:
    """timesteps: [batch] (any real/int dtype) -> [batch, hidden_size] out_dtype."""
    assert hidden_size % 2 == 0 and hidden_size >= 4, "hidden_size must be even and >= 4"
    half = hidden_size // 2
    b = timesteps.shape[0]

    # Frequency table hoisted to the wrapper (bit-identical to the reference exp,
    # and resident in VMEM across all grid steps).
    freqs = _make_freqs(hidden_size)
    t2d = timesteps.astype(jnp.float32).reshape(b, 1)   # no padding, no scatter

    # ---- tile selection --------------------------------------------------
    # Budget against default *scoped* VMEM (16 MiB v5e / 32 MiB v6e,v7x):
    # per step, double-buffered: out 2*tile*hidden*4 B + t 2*tile*128*4 B
    # (the (tile,1) block lane-pads to 128).  Keep <= ~10 MiB.
    vmem_budget = 10 * 1024 * 1024
    tile_vmem_cap = max(8, (vmem_budget // (8 * (hidden_size + 128))) // 8 * 8)
    tile = min(tile_b, tile_vmem_cap)
    if b >= 16:
        # Ensure >= 2 grid steps so v7x megacore ("parallel") has work to shard.
        tile = min(tile, ((b + 1) // 2 + 7) // 8 * 8)
    if tile >= b:
        tile = b                       # single block == full (possibly ragged) batch
    else:
        tile = max(8, (tile // 8) * 8)  # sublane-aligned; last block may be partial
    grid = pl.cdiv(b, tile)

    out_itemsize = jnp.dtype(out_dtype).itemsize
    out = pl.pallas_call(
        _timestep_emb_kernel,
        out_shape=jax.ShapeDtypeStruct((b, hidden_size), out_dtype),
        grid_spec=pltpu.PrefetchScalarGridSpec(
            num_scalar_prefetch=0,
            grid=(grid,),
            in_specs=[
                pl.BlockSpec((tile, 1), lambda i: (i, 0)),    # timesteps tile
                pl.BlockSpec((1, half), lambda i: (0, 0)),    # freqs, grid-resident
            ],
            out_specs=pl.BlockSpec((tile, hidden_size), lambda i: (i, 0)),
        ),
        compiler_params=pltpu.CompilerParams(
            dimension_semantics=("parallel",),                # megacore on v7x
        ),
        cost_estimate=pl.CostEstimate(
            flops=b * half * 33,          # mul + shared reduction + 2 polys + selects
            transcendentals=0,            # sincos is VALU polynomial, no EUP
            bytes_accessed=b * hidden_size * out_itemsize + b * 4 + half * 4,
        ),
    )(t2d, freqs)
    return out


if __name__ == "__main__":
    key = jax.random.PRNGKey(0)
    batch = 8
    hidden_size = 32
    # Diffusion timesteps: non-negative integer steps (like torch.randint).
    timesteps = jax.random.randint(key, (batch,), 0, 1000).astype(jnp.float32)

    out = diffusion_timestep_embedding(timesteps, hidden_size)
    out = jax.block_until_ready(out)
    assert out.shape == (batch, hidden_size), out.shape
    assert out.dtype == jnp.float32, out.dtype

    # Reference: the *same* f32 argument (same hoisted freqs, same IEEE f32
    # product), then float64 sin/cos as ground truth.  Only the kernel's own
    # fused-sincos error (~3e-7 abs) remains, so a tight, amplification-free
    # tolerance is safe and still catches structural bugs (swapped halves,
    # wrong freqs, lane-shifted stores, wrong quadrant logic, ...).
    freqs_np = np.asarray(_make_freqs(hidden_size))                  # (1, half) f32
    t_np = np.asarray(timesteps, dtype=np.float32)
    arg32 = (t_np[:, None] * freqs_np).astype(np.float32)            # == kernel arg
    ref = np.concatenate([np.sin(arg32.astype(np.float64)),
                          np.cos(arg32.astype(np.float64))], axis=-1)
    max_err = float(np.max(np.abs(np.asarray(out, dtype=np.float64) - ref)))
    assert max_err < 5e-5, f"mismatch vs reference: max abs err {max_err}"
    print("KERNEL_OK")
</pallas_src>

<mosaic_0001>
module attributes {stable_mosaic.version = 11 : i64} {
  func.func @_timestep_emb_kernel(%arg0: i32, %arg1: memref<8x1xf32, #tpu.memory_space<vmem>>, %arg2: memref<1x16xf32, #tpu.memory_space<vmem>>, %arg3: memref<8x32xf32, #tpu.memory_space<vmem>>) attributes {dimension_semantics = [#tpu.dimension_semantics<parallel>], iteration_bounds = array<i64: 1>, scalar_prefetch = 0 : i64, scratch_operands = 0 : i64, tpu.core_type = #tpu.core_type<tc>, window_params = [{transform_indices = @transform_0, window_bounds = array<i64: 8, 1>}, {pipeline_mode = #tpu.pipeline_mode<synchronous>, transform_indices = @transform_1, window_bounds = array<i64: 1, 16>}, {transform_indices = @transform_2, window_bounds = array<i64: 8, 32>}]} {
    %c0 = arith.constant 0 : index
    %c0_0 = arith.constant 0 : index
    %0 = vector.load %arg1[%c0, %c0_0] : memref<8x1xf32, #tpu.memory_space<vmem>>, vector<8x1xf32>
    %c0_1 = arith.constant 0 : index
    %c0_2 = arith.constant 0 : index
    %1 = vector.load %arg2[%c0_1, %c0_2] : memref<1x16xf32, #tpu.memory_space<vmem>>, vector<1x16xf32>
    %2 = vector.broadcast %0 : vector<8x1xf32> to vector<8x16xf32>
    %3 = vector.broadcast %1 : vector<1x16xf32> to vector<8x16xf32>
    %4 = arith.mulf %2, %3 : vector<8x16xf32>
    %cst = arith.constant 0.636619746 : f32
    %5 = vector.broadcast %cst : f32 to vector<8x16xf32>
    %6 = arith.mulf %4, %5 : vector<8x16xf32>
    %cst_3 = arith.constant 5.000000e-01 : f32
    %7 = vector.broadcast %cst_3 : f32 to vector<8x16xf32>
    %8 = arith.addf %6, %7 : vector<8x16xf32>
    %9 = math.floor %8 : vector<8x16xf32>
    %10 = arith.fptosi %9 : vector<8x16xf32> to vector<8x16xi32>
    %cst_4 = arith.constant 1.5703125 : f32
    %11 = vector.broadcast %cst_4 : f32 to vector<8x16xf32>
    %12 = arith.mulf %9, %11 : vector<8x16xf32>
    %13 = arith.subf %4, %12 : vector<8x16xf32>
    %cst_5 = arith.constant 4.83751297E-4 : f32
    %14 = vector.broadcast %cst_5 : f32 to vector<8x16xf32>
    %15 = arith.mulf %9, %14 : vector<8x16xf32>
    %16 = arith.subf %13, %15 : vector<8x16xf32>
    %cst_6 = arith.constant 7.549790e-08 : f32
    %17 = vector.broadcast %cst_6 : f32 to vector<8x16xf32>
    %18 = arith.mulf %9, %17 : vector<8x16xf32>
    %19 = arith.subf %16, %18 : vector<8x16xf32>
    %20 = arith.mulf %19, %19 : vector<8x16xf32>
    %21 = arith.mulf %19, %20 : vector<8x16xf32>
    %cst_7 = arith.constant -1.95152956E-4 : f32
    %22 = vector.broadcast %cst_7 : f32 to vector<8x16xf32>
    %23 = arith.mulf %20, %22 : vector<8x16xf32>
    %cst_8 = arith.constant 0.00833216123 : f32
    %24 = vector.broadcast %cst_8 : f32 to vector<8x16xf32>
    %25 = arith.addf %24, %23 : vector<8x16xf32>
    %26 = arith.mulf %20, %25 : vector<8x16xf32>
    %cst_9 = arith.constant -0.166666552 : f32
    %27 = vector.broadcast %cst_9 : f32 to vector<8x16xf32>
    %28 = arith.addf %27, %26 : vector<8x16xf32>
    %29 = arith.mulf %21, %28 : vector<8x16xf32>
    %30 = arith.addf %19, %29 : vector<8x16xf32>
    %cst_10 = arith.constant 5.000000e-01 : f32
    %31 = vector.broadcast %cst_10 : f32 to vector<8x16xf32>
    %32 = arith.mulf %31, %20 : vector<8x16xf32>
    %cst_11 = arith.constant 1.000000e+00 : f32
    %33 = vector.broadcast %cst_11 : f32 to vector<8x16xf32>
    %34 = arith.subf %33, %32 : vector<8x16xf32>
    %35 = arith.mulf %20, %20 : vector<8x16xf32>
    %cst_12 = arith.constant 2.44331568E-5 : f32
    %36 = vector.broadcast %cst_12 : f32 to vector<8x16xf32>
    %37 = arith.mulf %20, %36 : vector<8x16xf32>
    %cst_13 = arith.constant -0.00138873165 : f32
    %38 = vector.broadcast %cst_13 : f32 to vector<8x16xf32>
    %39 = arith.addf %38, %37 : vector<8x16xf32>
    %40 = arith.mulf %20, %39 : vector<8x16xf32>
    %cst_14 = arith.constant 0.0416666456 : f32
    %41 = vector.broadcast %cst_14 : f32 to vector<8x16xf32>
    %42 = arith.addf %41, %40 : vector<8x16xf32>
    %43 = arith.mulf %35, %42 : vector<8x16xf32>
    %44 = arith.addf %34, %43 : vector<8x16xf32>
    %c1_i32 = arith.constant 1 : i32
    %45 = vector.broadcast %c1_i32 : i32 to vector<8x16xi32>
    %46 = arith.andi %10, %45 : vector<8x16xi32>
    %c1_i32_15 = arith.constant 1 : i32
    %47 = vector.broadcast %c1_i32_15 : i32 to vector<8x16xi32>
    %48 = arith.cmpi eq, %46, %47 : vector<8x16xi32>
    %49 = arith.select %48, %44, %30 : vector<8x16xi1>, vector<8x16xf32>
    %50 = arith.select %48, %30, %44 : vector<8x16xi1>, vector<8x16xf32>
    %c2_i32 = arith.constant 2 : i32
    %51 = vector.broadcast %c2_i32 : i32 to vector<8x16xi32>
    %52 = arith.andi %10, %51 : vector<8x16xi32>
    %c0_i32 = arith.constant 0 : i32
    %53 = vector.broadcast %c0_i32 : i32 to vector<8x16xi32>
    %54 = arith.cmpi ne, %52, %53 : vector<8x16xi32>
    %cst_16 = arith.constant 0.000000e+00 : f32
    %55 = vector.broadcast %cst_16 : f32 to vector<8x16xf32>
    %56 = arith.subf %55, %49 : vector<8x16xf32>
    %57 = arith.select %54, %56, %49 : vector<8x16xi1>, vector<8x16xf32>
    %c1_i32_17 = arith.constant 1 : i32
    %58 = vector.broadcast %c1_i32_17 : i32 to vector<8x16xi32>
    %59 = arith.addi %10, %58 : vector<8x16xi32>
    %c2_i32_18 = arith.constant 2 : i32
    %60 = vector.broadcast %c2_i32_18 : i32 to vector<8x16xi32>
    %61 = arith.andi %59, %60 : vector<8x16xi32>
    %c0_i32_19 = arith.constant 0 : i32
    %62 = vector.broadcast %c0_i32_19 : i32 to vector<8x16xi32>
    %63 = arith.cmpi ne, %61, %62 : vector<8x16xi32>
    %cst_20 = arith.constant 0.000000e+00 : f32
    %64 = vector.broadcast %cst_20 : f32 to vector<8x16xf32>
    %65 = arith.subf %64, %50 : vector<8x16xf32>
    %66 = arith.select %63, %65, %50 : vector<8x16xi1>, vector<8x16xf32>
    %c0_21 = arith.constant 0 : index
    %c0_22 = arith.constant 0 : index
    %67 = vector.load %arg3[%c0_21, %c0_22] : memref<8x32xf32, #tpu.memory_space<vmem>>, vector<8x16xf32>
    tpu.vector_store %arg3[%c0_21, %c0_22], %57 {strides = array<i32>} : memref<8x32xf32, #tpu.memory_space<vmem>>, vector<8x16xf32>,
    %c0_23 = arith.constant 0 : index
    %c16 = arith.constant 16 : index
    %68 = vector.load %arg3[%c0_23, %c16] : memref<8x32xf32, #tpu.memory_space<vmem>>, vector<8x16xf32>
    tpu.vector_store %arg3[%c0_23, %c16], %66 {strides = array<i32>} : memref<8x32xf32, #tpu.memory_space<vmem>>, vector<8x16xf32>,
    return
  }
  func.func @transform_0(%arg0: i32) -> (i32, i32) {
    %c0_i32 = arith.constant 0 : i32
    %c0_i32_0 = arith.constant 0 : i32
    return %arg0, %c0_i32 : i32, i32
  }
  func.func @transform_1(%arg0: i32) -> (i32, i32) {
    %c0_i32 = arith.constant 0 : i32
    %c0_i32_0 = arith.constant 0 : i32
    %c0_i32_1 = arith.constant 0 : i32
    return %c0_i32, %c0_i32_0 : i32, i32
  }
  func.func @transform_2(%arg0: i32) -> (i32, i32) {
    %c0_i32 = arith.constant 0 : i32
    %c0_i32_0 = arith.constant 0 : i32
    return %arg0, %c0_i32 : i32, i32
  }
}

</mosaic_0001>

<bundles_post_ra>
// kernel: tpu_custom_call.1
= control target key start
LH: loop header
LB: loop body
LE: loop exit
PB: predicated region body
PF: predicated region fallthrough
CT: control target
= control target key end

     0   :  { %s144_s0 = inlined_call_operand.vmem [shape: f32[8,1], index: 0, kind: input, shape index: {}]   ;;  %s145_s1 = inlined_call_operand.vmem [shape: f32[1,16], index: 1, kind: input, shape index: {}]   ;;  %s146_s2 = inlined_call_operand.hbm [shape: f32[8,32], index: 2, kind: output, shape index: {}]  }
   0x1   :  { %v12_v0 = vld [vmem:[%s144_s0] sm:$0xff] }
   0x2   :  { %7 = vsyncpa [#allocation3], 0  ;;  %v117_v1 = vmov 0   ;;  %v88_v2 = vld [vmem:[%s145_s1] ss:$0 sm:$0xff]  ;;  %vm66_vm1 = vcmask 130048  }
   0x3   :  { %94 = vset.pattern.permute.xlu0 %v117_v1  ;;  %s118_s0 = smov 16   ;;  %s119_s1 = smov [#allocation2]   ;;  %vm72_vm4 = vcmask 261248  }
   0x4   :  { %16 = vperm.xlu0 %94, %v12_v0   ;;  %s80_s13 = sshll.u32 %s119_s1, 4  ;;  %s81_s13 = int_to_ptr.vmem [resolvable:$true] %s80_s13 }
   0x5   :  { %s95_s14 = scalar_lea.vmem %s81_s13, 128  ;;  %p100_p1 = scmp.lt.s32.totalorder %s81_s13, %s81_s13 }
   0x6   :  { %p96_p0 = scmp.ne.s32.totalorder %s81_s13, %s95_s14  ;;  %p101_p2 = scmp.lt.s32.totalorder %s95_s14, %s95_s14 }
   0x8   :  { %p102_p3 = por %p101_p2, %p100_p1 }
   0xa   :  { %p103_p4 = pnand %p102_p3, %p96_p0 }
  0x7f   :  { %v17_v3 = vpop.permute.xlu0 %16 }
  0x80   :  { %v25_v4 = vmul.f32 %v88_v2, %v17_v3 }
  0x82   :  { %v26_v5 = vmul.f32 0.63661975, %v25_v4 }
  0x84   :  { %v27_v6 = vadd.f32 0.5, %v26_v5 }
  0x86   :  { %v28_v7 = vfloor.f32 %v27_v6 }
  0x88   :  { %v30_v8 = vmul.f32 1.5703125, %v28_v7  ;;  %v32_v10 = vmul.f32 0.0004837513, %v28_v7  ;;  %v34_v12 = vmul.f32 7.54979e-08, %v28_v7  ;;  %v89_v15 = vtrunc.f32 %v28_v7 }
  0x8a   :  { %v31_v9 = vsub.f32 %v25_v4, %v30_v8  ;;  %v90_v19 = vcvt.f32.s32 %v89_v15 }
  0x8c   :  { %v33_v11 = vsub.f32 %v31_v9, %v32_v10  ;;  %v61_v28 = vadd.s32 1, %v90_v19  ;;  %v53_v30 = vand.u32 1, %v90_v19  ;;  %v57_v36 = vand.u32 2, %v90_v19 }
  0x8e   :  { %v35_v13 = vsub.f32 %v33_v11, %v34_v12  ;;  %v62_v35 = vand.u32 2, %v61_v28  ;;  %vm54_vm0 = vcmp.eq.s32.totalorder %v53_v30, 1  ;;  %vm58_vm3 = vcmp.ne.s32.totalorder %v57_v36, 0 }
  0x90   :  { %v36_v14 = vmul.f32 %v35_v13, %v35_v13  ;;  %vm63_vm2 = vcmp.ne.s32.totalorder %v62_v35, 0 }
  0x92   :  { %v38_v16 = vmul.f32 -0.00019515296, %v36_v14  ;;  %v47_v17 = vmul.f32 2.4433157e-05, %v36_v14  ;;  %v44_v22 = vmul.f32 0.5, %v36_v14  ;;  %v37_v24 = vmul.f32 %v36_v14, %v35_v13 }
  0x93   :  { %v46_v26 = vmul.f32 %v36_v14, %v36_v14 }
  0x94   :  { %v39_v18 = vadd.f32 0.008332161, %v38_v16  ;;  %v48_v20 = vadd.f32 -0.0013887316, %v47_v17  ;;  %v45_v31 = vsub.f32 1.0, %v44_v22 }
  0x96   :  { %v40_v21 = vmul.f32 %v39_v18, %v36_v14  ;;  %v49_v23 = vmul.f32 %v48_v20, %v36_v14 }
  0x98   :  { %v41_v25 = vadd.f32 -0.16666655, %v40_v21  ;;  %v50_v27 = vadd.f32 0.041666646, %v49_v23 }
  0x9a   :  { %v42_v29 = vmul.f32 %v41_v25, %v37_v24  ;;  %v51_v32 = vmul.f32 %v50_v27, %v46_v26 }
  0x9c   :  { %v43_v33 = vadd.f32 %v42_v29, %v35_v13  ;;  %v52_v34 = vadd.f32 %v51_v32, %v45_v31 }
  0x9e   :  { %v56_v37 = vsel %vm54_vm0, %v43_v33, %v52_v34  ;;  %v55_v38 = vsel %vm54_vm0, %v52_v34, %v43_v33 }
  0x9f   :  { %v64_v39 = vsub.f32 0.0, %v56_v37  ;;  %v59_v40 = vsub.f32 0.0, %v55_v38 }
  0xa1   :  { %v65_v41 = vsel %vm63_vm2, %v64_v39, %v56_v37  ;;  %v60_v42 = vsel %vm58_vm3, %v59_v40, %v55_v38 }
  0xa2   :  { %69 = vrot.lane.b32.xlu0 %v65_v41, %s118_s0  ;;  %67 = vst.msk [vmem:[#allocation2] sm:$0xff] %vm66_vm1, %v60_v42 }
 0x114   :  { %v70_v43 = vpop.permute.xlu0 %69 }
 0x115   :  { %73 = vst.msk [vmem:[#allocation2] sm:$0xff] %vm72_vm4, %v70_v43 }
 0x116   :  { %106 = shalt.err (!%p103_p4)
}
 0x117   :  { %83 = dma.vmem_to_hbm [thread:$0]  %s81_s13, 128, %s146_s2, [#allocation3]  }
 0x118   :  { %115 = dma.done.wait [#allocation3], 128  }
 0x119   :  { %116 = vsyncadd [#allocation3], 4294967168 }
 0x11a   :  { %87 = vsyncpa [#allocation3], 1 }

</bundles_post_ra>
